<compile_context>
chip_gen: v7x
topology: tpu7x:2x2x1
jax: 0.10.0
libtpu: 0.0.40
codegen_flags: <defaults>
</compile_context>

<pallas_src>
import functools
import math

import jax
import jax.numpy as jnp
import numpy as np
from jax.experimental import pallas as pl
from jax.experimental.pallas import tpu as pltpu


def _pe_add_kernel(x_ref, o_ref, *, d_model):
    """One row-block of the flattened [T, B*E] view: out = x + pe(t, e).

    pe is regenerated in-kernel from iota:
        e        = lane % d_model                (position inside embedding)
        parity   = e % 2                         (sin for even, cos for odd)
        inv_freq = exp(-(e - parity) * ln(10000)/d_model)   (== torch div_term)
        pe[t, e] = sin(t*inv_freq) if even else cos(t*inv_freq)
    """
    rows, cols = x_ref.shape                      # (block_rows, B*E), static
    t0 = pl.program_id(0) * rows                  # global sequence offset

    pos = (t0 + jax.lax.broadcasted_iota(jnp.int32, (rows, cols), 0)
           ).astype(jnp.float32)                  # sequence position per row
    lane = jax.lax.broadcasted_iota(jnp.int32, (rows, cols), 1)
    e_idx = lane % d_model                        # embedding index (batch-broadcast)
    parity = e_idx % 2
    k = (e_idx - parity).astype(jnp.float32)      # 2 * (e // 2)
    inv_freq = jnp.exp(k * (-math.log(10000.0) / d_model))
    ang = pos * inv_freq
    pe = jnp.where(parity == 0, jnp.sin(ang), jnp.cos(ang))   # f32

    # dropout(p=0) is identity in eval mode.
    o_ref[...] = (x_ref[...].astype(jnp.float32) + pe).astype(o_ref.dtype)


def positional_encoding_forward(x, *, block_rows=None, max_len=5000):
    """x: [seq_len, batch, d_model]  ->  x + pe[:seq_len] (broadcast over batch)."""
    T, B, E = x.shape
    assert T <= max_len, "sequence longer than the module's max_len buffer"
    assert E % 2 == 0, "d_model must be even (sin/cos interleave)"

    # Free contiguous reshape: lane-dense minor dim (B*E) instead of E.
    xf = x.reshape(T, B * E)

    if block_rows is None:
        block_rows = T if T <= 512 else 512       # multiple of 8 when < T
    block_rows = min(block_rows, T)
    grid = (pl.cdiv(T, block_rows),)

    # Size scoped VMEM from the actual buffers (in + out, double-buffered),
    # with 2x headroom; cap well below v7x's 64 MiB physical VMEM.
    slab = block_rows * B * E * xf.dtype.itemsize
    vmem_limit = int(min(max(8 * slab, 4 * 1024 * 1024), 48 * 1024 * 1024))

    out = pl.pallas_call(
        functools.partial(_pe_add_kernel, d_model=E),
        out_shape=jax.ShapeDtypeStruct((T, B * E), x.dtype),
        grid=grid,
        in_specs=[pl.BlockSpec((block_rows, B * E), lambda i: (i, 0))],
        out_specs=pl.BlockSpec((block_rows, B * E), lambda i: (i, 0)),
        compiler_params=pltpu.CompilerParams(
            dimension_semantics=("parallel",),    # megacore sharding on v7x
            vmem_limit_bytes=vmem_limit),
    )(xf)

    return out.reshape(T, B, E)


def positional_encoding_ref(x):
    """Pure-JAX reference with the exact torch formula (for verification)."""
    T, _, E = x.shape
    position = jnp.arange(T, dtype=jnp.float32)[:, None]
    div_term = jnp.exp(jnp.arange(0, E, 2, dtype=jnp.float32)
                       * (-math.log(10000.0) / E))
    pe = jnp.zeros((T, E), jnp.float32)
    pe = pe.at[:, 0::2].set(jnp.sin(position * div_term))
    pe = pe.at[:, 1::2].set(jnp.cos(position * div_term))
    return x + pe[:, None, :]


if __name__ == "__main__":
    key = jax.random.PRNGKey(0)

    # Small shapes consistent with the module: [seq_len, batch, d_model].
    seq_len, batch, d_model = 8, 2, 32
    x = jax.random.normal(key, (seq_len, batch, d_model), jnp.float32)

    out = positional_encoding_forward(x)
    out = jax.block_until_ready(out)
    assert out.shape == (seq_len, batch, d_model), out.shape
    assert bool(jnp.all(jnp.isfinite(out)))
    np.testing.assert_allclose(np.asarray(out),
                               np.asarray(positional_encoding_ref(x)),
                               rtol=1e-3, atol=1e-3)

    # Second check exercising a multi-step parallel grid (block_rows < T).
    x2 = jax.random.normal(jax.random.PRNGKey(1), (64, 2, 32), jnp.float32)
    out2 = jax.block_until_ready(
        positional_encoding_forward(x2, block_rows=16))
    np.testing.assert_allclose(np.asarray(out2),
                               np.asarray(positional_encoding_ref(x2)),
                               rtol=1e-3, atol=1e-3)

    print("KERNEL_OK")
</pallas_src>

<mosaic_0001>
module attributes {stable_mosaic.version = 11 : i64} {
  func.func @_pe_add_kernel(%arg0: i32, %arg1: memref<8x64xf32, #tpu.memory_space<vmem>>, %arg2: memref<8x64xf32, #tpu.memory_space<vmem>>) attributes {dimension_semantics = [#tpu.dimension_semantics<parallel>], iteration_bounds = array<i64: 1>, scalar_prefetch = 0 : i64, scratch_operands = 0 : i64, tpu.core_type = #tpu.core_type<tc>, window_params = [{transform_indices = @transform_0, window_bounds = array<i64: 8, 64>}, {transform_indices = @transform_1, window_bounds = array<i64: 8, 64>}]} {
    %c8_i32 = arith.constant 8 : i32
    %0 = arith.muli %arg0, %c8_i32 : i32
    %1 = tpu.iota {dimensions = array<i32: 0>} : vector<8x64xi32>
    %2 = vector.broadcast %0 : i32 to vector<8x64xi32>
    %3 = arith.addi %2, %1 : vector<8x64xi32>
    %4 = arith.sitofp %3 : vector<8x64xi32> to vector<8x64xf32>
    %5 = tpu.iota {dimensions = array<i32: 1>} : vector<8x64xi32>
    %c32_i32 = arith.constant 32 : i32
    %c0_i32 = arith.constant 0 : i32
    %6 = arith.cmpi eq, %c32_i32, %c0_i32 : i32
    %c1_i32 = arith.constant 1 : i32
    %7 = arith.select %6, %c1_i32, %c32_i32 : i32
    %8 = vector.broadcast %7 : i32 to vector<8x64xi32>
    %9 = arith.remsi %5, %8 : vector<8x64xi32>
    %c0_i32_0 = arith.constant 0 : i32
    %10 = vector.broadcast %c0_i32_0 : i32 to vector<8x64xi32>
    %11 = arith.cmpi ne, %9, %10 : vector<8x64xi32>
    %c0_i32_1 = arith.constant 0 : i32
    %12 = vector.broadcast %c0_i32_1 : i32 to vector<8x64xi32>
    %13 = arith.cmpi slt, %9, %12 : vector<8x64xi32>
    %c0_i32_2 = arith.constant 0 : i32
    %14 = arith.cmpi slt, %7, %c0_i32_2 : i32
    %15 = vector.broadcast %14 : i1 to vector<8x64xi1>
    %16 = vector.broadcast %15 : vector<8x64xi1> to vector<8x64xi1>
    %17 = arith.xori %13, %16 : vector<8x64xi1>
    %18 = arith.andi %17, %11 : vector<8x64xi1>
    %19 = vector.broadcast %7 : i32 to vector<8x64xi32>
    %20 = arith.addi %9, %19 : vector<8x64xi32>
    %21 = arith.select %18, %20, %9 : vector<8x64xi1>, vector<8x64xi32>
    %c2_i32 = arith.constant 2 : i32
    %c0_i32_3 = arith.constant 0 : i32
    %22 = arith.cmpi eq, %c2_i32, %c0_i32_3 : i32
    %c1_i32_4 = arith.constant 1 : i32
    %23 = arith.select %22, %c1_i32_4, %c2_i32 : i32
    %24 = vector.broadcast %23 : i32 to vector<8x64xi32>
    %25 = arith.remsi %21, %24 : vector<8x64xi32>
    %c0_i32_5 = arith.constant 0 : i32
    %26 = vector.broadcast %c0_i32_5 : i32 to vector<8x64xi32>
    %27 = arith.cmpi ne, %25, %26 : vector<8x64xi32>
    %c0_i32_6 = arith.constant 0 : i32
    %28 = vector.broadcast %c0_i32_6 : i32 to vector<8x64xi32>
    %29 = arith.cmpi slt, %25, %28 : vector<8x64xi32>
    %c0_i32_7 = arith.constant 0 : i32
    %30 = arith.cmpi slt, %23, %c0_i32_7 : i32
    %31 = vector.broadcast %30 : i1 to vector<8x64xi1>
    %32 = vector.broadcast %31 : vector<8x64xi1> to vector<8x64xi1>
    %33 = arith.xori %29, %32 : vector<8x64xi1>
    %34 = arith.andi %33, %27 : vector<8x64xi1>
    %35 = vector.broadcast %23 : i32 to vector<8x64xi32>
    %36 = arith.addi %25, %35 : vector<8x64xi32>
    %37 = arith.select %34, %36, %25 : vector<8x64xi1>, vector<8x64xi32>
    %38 = arith.subi %21, %37 : vector<8x64xi32>
    %39 = arith.sitofp %38 : vector<8x64xi32> to vector<8x64xf32>
    %cst = arith.constant -0.287823141 : f32
    %40 = vector.broadcast %cst : f32 to vector<8x64xf32>
    %41 = arith.mulf %39, %40 : vector<8x64xf32>
    %42 = math.exp %41 : vector<8x64xf32>
    %43 = arith.mulf %4, %42 : vector<8x64xf32>
    %c0_i32_8 = arith.constant 0 : i32
    %44 = vector.broadcast %c0_i32_8 : i32 to vector<8x64xi32>
    %45 = arith.cmpi eq, %37, %44 : vector<8x64xi32>
    %46 = math.sin %43 : vector<8x64xf32>
    %47 = math.cos %43 : vector<8x64xf32>
    %48 = arith.select %45, %46, %47 : vector<8x64xi1>, vector<8x64xf32>
    %c0 = arith.constant 0 : index
    %c0_9 = arith.constant 0 : index
    %49 = vector.load %arg1[%c0, %c0_9] : memref<8x64xf32, #tpu.memory_space<vmem>>, vector<8x64xf32>
    %50 = arith.addf %49, %48 : vector<8x64xf32>
    %c0_10 = arith.constant 0 : index
    %c0_11 = arith.constant 0 : index
    %51 = vector.load %arg2[%c0_10, %c0_11] : memref<8x64xf32, #tpu.memory_space<vmem>>, vector<8x64xf32>
    tpu.vector_store %arg2[%c0_10, %c0_11], %50 {strides = array<i32>} : memref<8x64xf32, #tpu.memory_space<vmem>>, vector<8x64xf32>,
    return
  }
  func.func @transform_0(%arg0: i32) -> (i32, i32) {
    %c0_i32 = arith.constant 0 : i32
    %c0_i32_0 = arith.constant 0 : i32
    return %arg0, %c0_i32 : i32, i32
  }
  func.func @transform_1(%arg0: i32) -> (i32, i32) {
    %c0_i32 = arith.constant 0 : i32
    %c0_i32_0 = arith.constant 0 : i32
    return %arg0, %c0_i32 : i32, i32
  }
}

</mosaic_0001>

<bundles_post_ra>
// kernel: tpu_custom_call.1
= control target key start
LH: loop header
LB: loop body
LE: loop exit
PB: predicated region body
PF: predicated region fallthrough
CT: control target
= control target key end

     0   :  { %6 = vsyncpa [#allocation3], 0  ;;  %s428_s0 = inlined_call_operand.hbm [shape: f32[8,64], index: 0, kind: input, shape index: {}]   ;;  %s429_s1 = inlined_call_operand.hbm [shape: f32[8,64], index: 1, kind: output, shape index: {}]  }
   0x1   :  { %7 = vsyncpa [#allocation4], 0  ;;  %s361_s6 = smov [#allocation2]   ;;  %s313_s10 = scalar_lea.hbm %s428_s0, 128 }
   0x2   :  { %s14_s7 = sshll.u32 %s361_s6, 4  ;;  %p314_p0 = scmp.ne.s32.totalorder %s428_s0, %s313_s10  ;;  %s15_s7 = int_to_ptr.vmem [resolvable:$true] %s14_s7 }
   0x3   :  { %p317_p1 = scmp.lt.u32.totalorder %s313_s10, %s428_s0 }
   0x5   :  { %p319_p2 = pnand %p317_p1, %p314_p0 }
   0x7   :  { %322 = shalt.err (!%p319_p2)
}
   0x8   :  { %s323_s15 = scalar_lea.vmem %s15_s7, 128  ;;  %p328_p4 = scmp.lt.s32.totalorder %s15_s7, %s15_s7 }
   0x9   :  { %p324_p3 = scmp.ne.s32.totalorder %s15_s7, %s323_s15  ;;  %p329_p5 = scmp.lt.s32.totalorder %s323_s15, %s323_s15 }
   0xb   :  { %p330_p6 = por %p329_p5, %p328_p4 }
   0xd   :  { %p331_p7 = pnand %p330_p6, %p324_p3 }
   0xf   :  { %334 = shalt.err (!%p331_p7)
}
  0x10   :  { %17 = dma.hbm_to_vmem [thread:$0]  %s428_s0, 128, %s15_s7, [#allocation3]  }
  0x11   :  { %357 = dma.done.wait [#allocation3], 128  }
  0x12   :  { %358 = vsyncadd [#allocation3], 4294967168  ;;  %v22_v0 = vlaneseq  ;;  %v362_v23 = vmov 683565275   ;;  %v363_v25 = vmov 2475754826  }
  0x13   :  { %v364_v27 = vmov 2131351028   ;;  %v365_v29 = vmov 2102212464   ;;  %v366_v31 = vmov 920167782  }
  0x14   :  { %v28_v1 = vand.u32 127, %v22_v0  ;;  %v23_v8 = vshrl.u32 %v22_v0, 7  ;;  %v367_v38 = vmov 1326507024   ;;  %s368_s0 = smov [#allocation5]  }
  0x15   :  { %s278_s18 = sshll.u32 %s368_s0, 4  ;;  %s279_s18 = int_to_ptr.vmem [resolvable:$true] %s278_s18 }
  0x16   :  { %v33_v2 = vand.u32 31, %v28_v1  ;;  %v26_v9 = vcvt.s32.f32 %v23_v8  ;;  %s335_s19 = scalar_lea.vmem %s279_s18, 128  ;;  %p340_p9 = scmp.lt.s32.totalorder %s279_s18, %s279_s18 }
  0x17   :  { %p336_p8 = scmp.ne.s32.totalorder %s279_s18, %s335_s19  ;;  %p341_p10 = scmp.lt.s32.totalorder %s335_s19, %s335_s19 }
  0x18   :  { %v391_v3 = vand.u32 1, %v33_v2 }
  0x19   :  { %p342_p11 = por %p341_p10, %p340_p9 }
  0x1a   :  { %v53_v4 = vsub.s32 %v33_v2, %v391_v3 }
  0x1b   :  { %p343_p12 = pnand %p342_p11, %p336_p8 }
  0x1c   :  { %v54_v5 = vcvt.s32.f32 %v53_v4 }
  0x1e   :  { %v55_v6 = vmul.f32 -0.28782314, %v54_v5 }
  0x20   :  { %v56_v7 = vmul.f32 1.442695, %v55_v6 }
  0x22   :  { %307 = vpow2.f32 %v56_v7 }
  0x2c   :  { %v308_v10 = vpop.eup %307 }
  0x2d   :  { %v394_v11 = vmul.f32 %v308_v10, %v26_v9 }
  0x2f   :  { %v63_v12 = vand.u32 2139095040, %v394_v11  ;;  %v60_v14 = vand.u32 2147483647, %v394_v11  ;;  %vm62_vm7 = vcmp.lt.s32.totalorder %v394_v11, 0  ;;  %vm152_vm15 = vweird.f32 %v394_v11 }
  0x31   :  { %v64_v13 = vshrl.u32 %v63_v12, 23  ;;  %v67_v17 = vand.u32 8388607, %v60_v14  ;;  %vm61_vm8 = vcmp.le.f32.partialorder %v60_v14, 0.7853982 }
  0x33   :  { %v287_v15 = vadd.s32 4294967169, %v64_v13  ;;  %v68_v20 = vor.u32 8388608, %v67_v17 }
  0x35   :  { %v70_v16 = vadd.s32 1, %v287_v15  ;;  %v108_v40 = vshll.u32 %v68_v20, 8 }
  0x37   :  { %vm71_vm0 = vcmp.gt.s32.totalorder %v70_v16, 0 }
  0x38   :  { %v72_v18 = vsel %vm71_vm0, %v70_v16, 0  ;;  %vm59_vm0 = vcmp.eq.s32.totalorder %v391_v3, 0 }
  0x39   :  { %v74_v19 = vand.u32 31, %v72_v18  ;;  %v73_v21 = vshrl.u32 %v72_v18, 5 }
  0x3b   :  { %v75_v22 = vsub.s32 32, %v74_v19  ;;  %v77_v24 = vshll.u32 %v362_v23, %v74_v19  ;;  %v80_v26 = vshll.u32 %v363_v25, %v74_v19  ;;  %v83_v28 = vshll.u32 %v364_v27, %v74_v19 }
  0x3c   :  { %v86_v30 = vshll.u32 %v365_v29, %v74_v19  ;;  %v89_v32 = vshll.u32 %v366_v31, %v74_v19  ;;  %vm92_vm1 = vcmp.lt.s32.totalorder %v73_v21, 1  ;;  %vm95_vm2 = vcmp.lt.s32.totalorder %v73_v21, 4 }
  0x3d   :  { %v76_v33 = vshrl.u32 %v362_v23, %v75_v22  ;;  %v78_v34 = vshrl.u32 %v363_v25, %v75_v22  ;;  %v81_v35 = vshrl.u32 %v364_v27, %v75_v22  ;;  %v84_v36 = vshrl.u32 %v365_v29, %v75_v22 }
  0x3e   :  { %v87_v37 = vshrl.u32 %v366_v31, %v75_v22  ;;  %v90_v39 = vshrl.u32 %v367_v38, %v75_v22  ;;  %vm93_vm3 = vcmp.lt.s32.totalorder %v73_v21, 2  ;;  %vm94_vm4 = vcmp.lt.s32.totalorder %v73_v21, 3 }
  0x3f   :  { %v79_v41 = vor.u32 %v78_v34, %v77_v24  ;;  %v82_v42 = vor.u32 %v81_v35, %v80_v26  ;;  %v85_v43 = vor.u32 %v84_v36, %v83_v28 }
  0x40   :  { %v88_v44 = vor.u32 %v87_v37, %v86_v30  ;;  %v91_v45 = vor.u32 %v90_v39, %v89_v32 }
  0x41   :  { %v96_v46 = vsel %vm92_vm1, %v76_v33, %v79_v41  ;;  %v97_v47 = vsel %vm95_vm2, %v85_v43, 2102212464  ;;  %v100_v48 = vsel %vm92_vm1, %v79_v41, %v82_v42  ;;  %v104_v49 = vsel %vm92_vm1, %v82_v42, %v85_v43 }
  0x42   :  { %v98_v50 = vsel %vm94_vm4, %v82_v42, %v97_v47  ;;  %v101_v51 = vsel %vm95_vm2, %v88_v44, 920167782  ;;  %v105_v52 = vsel %vm95_vm2, %v91_v45, 1326507024  ;;  %vm270_vm1 = vcmask 523264  }
  0x43   :  { %v102_v53 = vsel %vm94_vm4, %v85_v43, %v101_v51  ;;  %v106_v54 = vsel %vm94_vm4, %v88_v44, %v105_v52  ;;  %v99_v55 = vsel %vm93_vm3, %v96_v46, %v98_v50  ;;  %v268_v44 = vld [vmem:[#allocation2] sm:$0xff] }
  0x44   :  { %v103_v56 = vsel %vm93_vm3, %v100_v48, %v102_v53  ;;  %v107_v57 = vsel %vm93_vm3, %v104_v49, %v106_v54  ;;  %v115_v62 = vmul.u32 %v108_v40, %v99_v55 }
  0x45   :  { %v400_v58 = vmul.u32.u64.low %v108_v40, %v107_v57  ;;  %v401_v59 = vmul.u32.u64.high %v108_v40, %v107_v57, %v400_v58  ;;  %v403_v60 = vmul.u32.u64.low %v108_v40, %v103_v56  ;;  %v404_v61 = vmul.u32.u64.high %v108_v40, %v103_v56, %v403_v60 }
  0x47   :  { %vm117_vm5 = vc.u32 %v401_v59, %v403_v60  ;;  %v118_v63 = vadd.s32 1, %v404_v61  ;;  %v116_v12 = vadd.s32 %v403_v60, %v401_v59 }
  0x49   :  { %v119_v0 = vsel %vm117_vm5, %v118_v63, %v404_v61 }
  0x4a   :  { %v120_v1 = vadd.s32 %v119_v0, %v115_v62 }
  0x4c   :  { %v121_v2 = vadd.s32 536870912, %v120_v1 }
  0x4e   :  { %v122_v4 = vshrl.u32 %v121_v2, 30 }
  0x50   :  { %v123_v5 = vshll.u32 %v122_v4, 30  ;;  %v146_v25 = vsub.s32 4, %v122_v4 }
  0x52   :  { %v124_v6 = vsub.s32 %v120_v1, %v123_v5  ;;  %v147_v28 = vsel %vm62_vm7, %v146_v25, %v122_v4 }
  0x53   :  { %v149_v31 = vsel %vm61_vm8, 0, %v147_v28 }
  0x54   :  { %v126_v7 = vsub.s32 0, %v124_v6  ;;  %v153_v32 = vadd.s32 3, %v149_v31  ;;  %v257_v34 = vand.u32 3, %v149_v31 }
  0x56   :  { %v288_v8 = vmin.u32 %v126_v7, %v124_v6  ;;  %v154_v33 = vand.u32 3, %v153_v32  ;;  %vm262_vm10 = vcmp.eq.s32.totalorder %v257_v34, 2  ;;  %vm259_vm12 = vcmp.eq.s32.totalorder %v257_v34, 0 }
  0x57   :  { %vm258_vm14 = vcmp.lt.s32.totalorder %v257_v34, 2 }
  0x58   :  { %v128_v9 = vclz %v288_v8  ;;  %vm159_vm9 = vcmp.eq.s32.totalorder %v154_v33, 2  ;;  %vm156_vm11 = vcmp.eq.s32.totalorder %v154_v33, 0  ;;  %vm155_vm13 = vcmp.lt.s32.totalorder %v154_v33, 2 }
  0x5a   :  { %v289_v10 = vadd.s32 4294967294, %v128_v9 }
  0x5c   :  { %vm290_vm6 = vcmp.lt.s32.totalorder %v289_v10, 0 }
  0x5d   :  { %v131_v13 = vsel %vm290_vm6, 0, %v289_v10 }
  0x5e   :  { %v132_v15 = vsub.s32 32, %v131_v13  ;;  %v133_v16 = vshll.u32 %v124_v6, %v131_v13  ;;  %v136_v17 = vsub.s32 4294967266, %v131_v13 }
  0x60   :  { %v134_v18 = vshrl.u32 %v116_v12, %v132_v15  ;;  %v137_v19 = vadd.s32 127, %v136_v17 }
  0x62   :  { %v135_v20 = vor.u32 %v134_v18, %v133_v16  ;;  %v138_v21 = vshll.u32 %v137_v19, 23 }
  0x64   :  { %v139_v22 = vor.u32 4788187, %v138_v21  ;;  %v142_v23 = vcvt.s32.f32 %v135_v20 }
  0x66   :  { %v140_v24 = vand.u32 2147483647, %v139_v22 }
  0x68   :  { %v143_v26 = vmul.f32 %v142_v23, %v140_v24 }
  0x6a   :  { %v144_v27 = vxor.u32 2147483648, %v143_v26 }
  0x6c   :  { %v145_v29 = vsel %vm62_vm7, %v144_v27, %v143_v26 }
  0x6d   :  { %v148_v30 = vsel %vm61_vm8, %v394_v11, %v145_v29 }
  0x6e   :  { %309 = vcosq.f32 %v148_v30 }
  0x6f   :  { %311 = vsinq.f32 %v148_v30 }
  0x78   :  { %v310_v35 = vpop.eup %309 }
  0x79   :  { %v312_v36 = vpop.eup %311  ;;  %v160_v37 = vxor.u32 2147483648, %v310_v35 }
  0x7a   :  { %v157_v14 = vxor.u32 2147483648, %v312_v36 }
  0x7b   :  { %v161_v38 = vsel %vm159_vm9, %v160_v37, %v312_v36  ;;  %v264_v39 = vsel %vm262_vm10, %v160_v37, %v312_v36 }
  0x7c   :  { %v158_v40 = vsel %vm156_vm11, %v310_v35, %v157_v14  ;;  %v261_v41 = vsel %vm259_vm12, %v310_v35, %v157_v14 }
  0x7d   :  { %v162_v42 = vsel %vm155_vm13, %v158_v40, %v161_v38  ;;  %v265_v43 = vsel %vm258_vm14, %v261_v41, %v264_v39 }
  0x7e   :  { %v163_v45 = vsel %vm152_vm15, nan, %v162_v42  ;;  %v266_v46 = vsel %vm152_vm15, nan, %v265_v43 }
  0x7f   :  { %v267_v47 = vsel %vm59_vm0, %v163_v45, %v266_v46 }
  0x80   :  { %v269_v48 = vadd.f32 %v268_v44, %v267_v47 }
  0x82   :  { %271 = vst.msk [vmem:[#allocation5] sm:$0xff] %vm270_vm1, %v269_v48 }
  0x83   :  { %346 = shalt.err (!%p343_p12)
}
  0x84   :  { %s347_s22 = scalar_lea.hbm %s429_s1, 128 }
  0x85   :  { %p348_p13 = scmp.ne.s32.totalorder %s429_s1, %s347_s22  ;;  %p351_p0 = scmp.lt.u32.totalorder %s347_s22, %s429_s1 }
  0x87   :  { %p353_p1 = pnand %p351_p0, %p348_p13 }
  0x89   :  { %356 = shalt.err (!%p353_p1)
}
  0x8a   :  { %281 = dma.vmem_to_hbm [thread:$0]  %s279_s18, 128, %s429_s1, [#allocation4]  }
  0x8b   :  { %359 = dma.done.wait [#allocation4], 128  }
  0x8c   :  { %360 = vsyncadd [#allocation4], 4294967168 }
  0x8d   :  { %285 = vsyncpa [#allocation3], 1 }
  0x8e   :  { %286 = vsyncpa [#allocation4], 1 }

</bundles_post_ra>
